<compile_context>
chip_gen: v5e
topology: v5e:2x2
jax: 0.10.0
libtpu: 0.0.40
codegen_flags: <defaults>
</compile_context>

<pallas_src>
import functools
from typing import NamedTuple

import jax
import jax.numpy as jnp
from jax.experimental import pallas as pl
from jax.experimental.pallas import tpu as pltpu

LANE = 128
SUBLANE = 8


def _round_up(x, m):
    return ((x + m - 1) // m) * m


def _pad_last(x, target):
    pad = target - x.shape[-1]
    if pad <= 0:
        return x
    return jnp.pad(x, [(0, 0)] * (x.ndim - 1) + [(0, pad)])


class CASFENDConfig(NamedTuple):
    D: int
    EMO: int
    HID: int
    CAT: int
    Dp: int
    Hp: int
    Cp: int
    r_We: int
    r_be: int
    r_W1: int
    r_b1: int
    r_W2: int
    r_b2: int
    w_rows: int


# ------------------------------------------------------------------
# One-time parameter preparation (OUTSIDE the jitted per-call path).
# Lane-pads every weight tile with zeros, 8-row aligns the segments and
# concatenates them into a single (w_rows, 128) VMEM block.
# ------------------------------------------------------------------
def prepare_params(params):
    D = params["emb_table"].shape[-1]
    EMO = params["We"].shape[0]
    HID = params["W1"].shape[-1]
    CAT = params["W2"].shape[-1]
    Dp, Hp, Cp = (_round_up(d, LANE) for d in (D, HID, CAT))
    # Single-lane-tile concat layout; holds for emb/mlp/category dims <= 128.
    # TODO(synk): for larger dims pad all columns to max(Dp,Hp,Cp) instead.
    assert Dp == Hp == Cp == LANE, "weight-block layout assumes padded dims == 128"

    def seg(rows_alloc, mat, r_used, c_used):
        blk = jnp.zeros((rows_alloc, LANE), jnp.float32)
        return blk.at[:r_used, :c_used].set(
            jnp.asarray(mat, jnp.float32).reshape(r_used, c_used))

    n_emo = _round_up(EMO, SUBLANE)
    r_We = 0
    r_be = r_We + n_emo
    r_W1 = r_be + SUBLANE
    r_b1 = r_W1 + Dp
    r_W2 = r_b1 + SUBLANE
    r_b2 = r_W2 + Hp
    w_rows = r_b2 + SUBLANE

    weights = jnp.concatenate([
        seg(n_emo, params["We"], EMO, D),
        seg(SUBLANE, params["be"], 1, D),
        seg(Dp, params["W1"], D, HID),
        seg(SUBLANE, params["b1"], 1, HID),
        seg(Hp, params["W2"], HID, CAT),
        seg(SUBLANE, params["b2"], 1, CAT),
    ], axis=0)
    assert weights.shape == (w_rows, LANE)

    cfg = CASFENDConfig(D, EMO, HID, CAT, Dp, Hp, Cp,
                        r_We, r_be, r_W1, r_b1, r_W2, r_b2, w_rows)
    prepared = {
        "emb_table": jnp.asarray(params["emb_table"], jnp.float32),  # native D
        "w": jnp.asarray(params["w"], jnp.float32),
        "weights": weights,
    }
    return cfg, prepared


# ------------------------------------------------------------------
# Fused kernel: whole batch, single invocation (no grid).
#   scal_ref : (3 + N*C,) f32  SMEM   [w0, w1, w2, comment-mean weights (N*C)]
#   bert_ref : (N, La, Dp)     VMEM   lane-padded content features
#   cemb_ref : (N, C, Lc, Dp)  VMEM   lane-padded comment embeddings
#   emo_ref  : (N, EMO)        VMEM
#   wts_ref  : (w_rows, 128)   VMEM   concatenated We|be|W1|b1|W2|b2 tiles
#   out_ref  : (N, Cp)  f32    VMEM   lane-dense padded logits
#   b_scr    : (N, Lc, Dp) f32 VMEM   scratch for the pooled comment feature
# ------------------------------------------------------------------
def casfend_fused_kernel(cfg, scal_ref, bert_ref, cemb_ref, emo_ref, wts_ref,
                         out_ref, b_scr):
    N, C, Lc, Dp = cemb_ref.shape
    EMO = emo_ref.shape[1]

    # ---- 1) masked mean over comments (weights precomputed, read from SMEM) ----
    for n in range(N):
        acc = scal_ref[3 + n * C] * cemb_ref[n, 0]
        for c in range(1, C):
            acc = acc + scal_ref[3 + n * C + c] * cemb_ref[n, c]
        b_scr[n] = acc
    B = b_scr[...]                                              # (N, Lc, Dp)
    A = bert_ref[...]                                           # (N, La, Dp)

    # ---- 2) co-attention, transpose-free ----
    # TODO(synk): at BERT-scale La/Lb/D cast A/B to bf16 before the MXU ops
    # (keep preferred_element_type=f32) for full MXU rate; f32 here keeps the
    # toy-shape 1e-3 correctness check tight.
    s = jnp.einsum('nad,nbd->nab', A, B,
                   preferred_element_type=jnp.float32)          # (N, La, Lb)
    # A attends to B: row softmax (last dim)
    m_row = jnp.max(s, axis=-1, keepdims=True)
    p = jnp.exp(s - m_row)
    attn_ab = p / jnp.sum(p, axis=-1, keepdims=True)            # (N, La, Lb)
    # B attends to A: column softmax of the SAME tile (== attn_ba transposed)
    m_col = jnp.max(s, axis=1, keepdims=True)                   # (N, 1, Lb)
    q = jnp.exp(s - m_col)
    attn_ba_t = q / jnp.sum(q, axis=1, keepdims=True)           # = attn_ba^T

    # ---- 3) mean pooling commuted through the matmuls ----
    pool_ab = jnp.mean(attn_ab, axis=1, keepdims=True)          # (N, 1, Lb)
    coA = jnp.einsum('nxb,nbd->nxd', pool_ab, B,
                     preferred_element_type=jnp.float32).reshape(N, Dp)
    pool_ba = jnp.mean(attn_ba_t, axis=2, keepdims=True)        # (N, La, 1)
    coB = jnp.sum(pool_ba * A, axis=1)                          # (N, Dp)

    # ---- 4) emotion MLP, weighted combine, 2-layer classifier ----
    We = wts_ref[pl.ds(cfg.r_We, EMO), :]                       # (EMO, Dp)
    be = wts_ref[pl.ds(cfg.r_be, 1), :]                         # (1, Dp)
    W1 = wts_ref[pl.ds(cfg.r_W1, Dp), :]                        # (Dp, Hp)
    b1 = wts_ref[pl.ds(cfg.r_b1, 1), :]                         # (1, Hp)
    W2 = wts_ref[pl.ds(cfg.r_W2, cfg.Hp), :]                    # (Hp, Cp)
    b2 = wts_ref[pl.ds(cfg.r_b2, 1), :]                         # (1, Cp)

    emo_feat = jnp.tanh(
        jnp.dot(emo_ref[...], We, preferred_element_type=jnp.float32) + be)

    x = scal_ref[0] * coA + scal_ref[1] * coB + scal_ref[2] * emo_feat

    h = jnp.maximum(
        jnp.dot(x, W1, preferred_element_type=jnp.float32) + b1, 0.0)
    # dropout is identity at inference
    out_ref[...] = jnp.dot(h, W2, preferred_element_type=jnp.float32) + b2


# ------------------------------------------------------------------
# Forward: token-id gathers + tiny activation padding in XLA, rest fused.
# ------------------------------------------------------------------
def casfend_forward(cfg, prepared, content, content_masks, emotion, comment,
                    comment_num):
    del content_masks  # only consumed by BERT / the dead GRU+MaskAttention branch
    N = content.shape[0]
    C, Lc = comment.shape[1], comment.shape[2]
    emb = prepared["emb_table"]                                  # (V, D) native

    # synthetic BERT: gather at native D, lane-pad only the small activations
    bert_feature = _pad_last(emb[content], cfg.Dp)               # (N, La, Dp)
    comment_emb = _pad_last(emb[comment], cfg.Dp)                # (N, C, Lc, Dp)

    # per-(sample, comment) mean weights; matches torch `max_len = num or 1`
    cnt = jnp.clip(comment_num.astype(jnp.int32), 1, C)
    cw = jnp.where(jnp.arange(C)[None, :] < cnt[:, None],
                   1.0 / cnt[:, None].astype(jnp.float32), 0.0)  # (N, C)
    scalars = jnp.concatenate([prepared["w"],
                               cw.reshape(-1)]).astype(jnp.float32)

    vmem = pl.BlockSpec(memory_space=pltpu.MemorySpace.VMEM)
    smem = pl.BlockSpec(memory_space=pltpu.MemorySpace.SMEM)

    # TODO(synk): at production shapes (BERT D=768, large N/C/Lc) switch to a
    # grid over N with per-sample BlockSpecs + dimension_semantics=("parallel",)
    # (2 TCs on v7x), raise vmem_limit_bytes (v5e scoped default is 16 MiB),
    # and fold the token-id gathers into the kernel via PrefetchScalarGridSpec
    # row gathers instead of materializing comment_emb in HBM.
    out_p = pl.pallas_call(
        functools.partial(casfend_fused_kernel, cfg),
        out_shape=jax.ShapeDtypeStruct((N, cfg.Cp), jnp.float32),
        in_specs=[smem, vmem, vmem, vmem, vmem],
        out_specs=vmem,
        scratch_shapes=[pltpu.VMEM((N, Lc, cfg.Dp), jnp.float32)],
    )(scalars, bert_feature, comment_emb, emotion.astype(jnp.float32),
      prepared["weights"])

    logits = out_p[:, :cfg.CAT]
    return logits[:, 0] if cfg.CAT == 1 else logits              # .squeeze(1)


# ------------------------------------------------------------------
# Pure-JAX reference (unpadded) for the correctness check
# ------------------------------------------------------------------
def reference_forward(content, content_masks, emotion, comment, comment_num,
                      params):
    del content_masks
    emb_table = params["emb_table"]
    bert_feature = emb_table[content]
    comment_emb = emb_table[comment]
    C = comment_emb.shape[1]

    cnt = jnp.minimum(jnp.maximum(comment_num, 1), C)
    mask = jnp.arange(C)[None, :, None, None] < cnt[:, None, None, None]
    comment_feature = (jnp.sum(jnp.where(mask, comment_emb, 0.0), axis=1)
                       / cnt[:, None, None].astype(jnp.float32))

    A, B = bert_feature, comment_feature
    s = jnp.einsum("nld,nmd->nlm", A, B)
    attn_ab = jax.nn.softmax(s, axis=-1)
    attn_ba = jax.nn.softmax(jnp.swapaxes(s, 1, 2), axis=-1)
    coA = jnp.mean(jnp.einsum("nlm,nmd->nld", attn_ab, B), axis=1)
    coB = jnp.mean(jnp.einsum("nml,nld->nmd", attn_ba, A), axis=1)

    emo_feat = jnp.tanh(emotion @ params["We"] + params["be"])
    w = params["w"]
    x = w[0] * coA + w[1] * coB + w[2] * emo_feat
    h = jnp.maximum(x @ params["W1"] + params["b1"], 0.0)
    out = h @ params["W2"] + params["b2"]
    return out[:, 0]


if __name__ == "__main__":
    # small shapes consistent with the module
    N, L, C, Lc = 2, 16, 4, 8          # batch, content seq, #comments, comment seq
    D, EMO, HID, CAT = 32, 16, 32, 1   # emb_dim, emo_dim, mlp_dims, category
    VOCAB = 50

    key = jax.random.PRNGKey(0)
    ks = jax.random.split(key, 10)

    params = {
        "emb_table": jax.random.normal(ks[0], (VOCAB, D), jnp.float32) * 0.5,
        "w": jnp.array([1.0, 1.0, 1.0], jnp.float32),       # nn.Parameter([1,1,1])
        "We": jax.random.normal(ks[1], (EMO, D), jnp.float32) * 0.1,
        "be": jax.random.normal(ks[2], (D,), jnp.float32) * 0.1,
        "W1": jax.random.normal(ks[3], (D, HID), jnp.float32) * 0.1,
        "b1": jax.random.normal(ks[4], (HID,), jnp.float32) * 0.1,
        "W2": jax.random.normal(ks[5], (HID, CAT), jnp.float32) * 0.1,
        "b2": jax.random.normal(ks[6], (CAT,), jnp.float32) * 0.1,
    }

    content = jax.random.randint(ks[7], (N, L), 0, VOCAB, dtype=jnp.int32)
    content_masks = jnp.ones((N, L), jnp.float32)
    comment = jax.random.randint(ks[8], (N, C, Lc), 0, VOCAB, dtype=jnp.int32)
    comment_num = jnp.array([3, 0], dtype=jnp.int32)   # exercise >0 and ==0 branches
    emotion = jax.random.normal(ks[9], (N, EMO), jnp.float32)

    # one-time parameter prep (padding / concat hoisted out of the jitted path)
    cfg, prepared = prepare_params(params)

    fwd = jax.jit(functools.partial(casfend_forward, cfg))
    out = fwd(prepared, content, content_masks, emotion, comment, comment_num)
    out = jax.block_until_ready(out)

    ref = reference_forward(content, content_masks, emotion, comment,
                            comment_num, params)

    assert out.shape == (N,), out.shape
    assert jnp.allclose(out, ref, atol=1e-3, rtol=1e-3), (out, ref)
    print("KERNEL_OK")
</pallas_src>

<mosaic_0001>
module attributes {stable_mosaic.version = 11 : i64} {
  func.func @casfend_fused_kernel(%arg0: memref<11xf32, #tpu.memory_space<smem>>, %arg1: memref<2x16x128xf32, #tpu.memory_space<vmem>>, %arg2: memref<2x4x8x128xf32, #tpu.memory_space<vmem>>, %arg3: memref<2x16xf32, #tpu.memory_space<vmem>>, %arg4: memref<296x128xf32, #tpu.memory_space<vmem>>, %arg5: memref<2x128xf32, #tpu.memory_space<vmem>>, %arg6: memref<2x8x128xf32, #tpu.memory_space<vmem>>) attributes {dimension_semantics = [], scalar_prefetch = 0 : i64, scratch_operands = 1 : i64, tpu.core_type = #tpu.core_type<tc>} {
    %c3 = arith.constant 3 : index
    %0 = memref.load %arg0[%c3] : memref<11xf32, #tpu.memory_space<smem>>
    %c0 = arith.constant 0 : index
    %c0_0 = arith.constant 0 : index
    %c0_1 = arith.constant 0 : index
    %c0_2 = arith.constant 0 : index
    %1 = vector.load %arg2[%c0, %c0_0, %c0_1, %c0_2] : memref<2x4x8x128xf32, #tpu.memory_space<vmem>>, vector<1x1x8x128xf32>
    %2 = vector.shape_cast %1 : vector<1x1x8x128xf32> to vector<8x128xf32>
    %3 = vector.broadcast %0 : f32 to vector<8x128xf32>
    %4 = arith.mulf %3, %2 : vector<8x128xf32>
    %c4 = arith.constant 4 : index
    %5 = memref.load %arg0[%c4] : memref<11xf32, #tpu.memory_space<smem>>
    %c0_3 = arith.constant 0 : index
    %c1 = arith.constant 1 : index
    %c0_4 = arith.constant 0 : index
    %c0_5 = arith.constant 0 : index
    %6 = vector.load %arg2[%c0_3, %c1, %c0_4, %c0_5] : memref<2x4x8x128xf32, #tpu.memory_space<vmem>>, vector<1x1x8x128xf32>
    %7 = vector.shape_cast %6 : vector<1x1x8x128xf32> to vector<8x128xf32>
    %8 = vector.broadcast %5 : f32 to vector<8x128xf32>
    %9 = arith.mulf %8, %7 : vector<8x128xf32>
    %10 = arith.addf %4, %9 : vector<8x128xf32>
    %c5 = arith.constant 5 : index
    %11 = memref.load %arg0[%c5] : memref<11xf32, #tpu.memory_space<smem>>
    %c0_6 = arith.constant 0 : index
    %c2 = arith.constant 2 : index
    %c0_7 = arith.constant 0 : index
    %c0_8 = arith.constant 0 : index
    %12 = vector.load %arg2[%c0_6, %c2, %c0_7, %c0_8] : memref<2x4x8x128xf32, #tpu.memory_space<vmem>>, vector<1x1x8x128xf32>
    %13 = vector.shape_cast %12 : vector<1x1x8x128xf32> to vector<8x128xf32>
    %14 = vector.broadcast %11 : f32 to vector<8x128xf32>
    %15 = arith.mulf %14, %13 : vector<8x128xf32>
    %16 = arith.addf %10, %15 : vector<8x128xf32>
    %c6 = arith.constant 6 : index
    %17 = memref.load %arg0[%c6] : memref<11xf32, #tpu.memory_space<smem>>
    %c0_9 = arith.constant 0 : index
    %c3_10 = arith.constant 3 : index
    %c0_11 = arith.constant 0 : index
    %c0_12 = arith.constant 0 : index
    %18 = vector.load %arg2[%c0_9, %c3_10, %c0_11, %c0_12] : memref<2x4x8x128xf32, #tpu.memory_space<vmem>>, vector<1x1x8x128xf32>
    %19 = vector.shape_cast %18 : vector<1x1x8x128xf32> to vector<8x128xf32>
    %20 = vector.broadcast %17 : f32 to vector<8x128xf32>
    %21 = arith.mulf %20, %19 : vector<8x128xf32>
    %22 = arith.addf %16, %21 : vector<8x128xf32>
    %c0_13 = arith.constant 0 : index
    %c0_14 = arith.constant 0 : index
    %c0_15 = arith.constant 0 : index
    %23 = vector.load %arg6[%c0_13, %c0_14, %c0_15] : memref<2x8x128xf32, #tpu.memory_space<vmem>>, vector<1x8x128xf32>
    %24 = vector.shape_cast %23 : vector<1x8x128xf32> to vector<8x128xf32>
    %25 = vector.shape_cast %22 : vector<8x128xf32> to vector<1x8x128xf32>
    tpu.vector_store %arg6[%c0_13, %c0_14, %c0_15], %25 {strides = array<i32>} : memref<2x8x128xf32, #tpu.memory_space<vmem>>, vector<1x8x128xf32>,
    %c7 = arith.constant 7 : index
    %26 = memref.load %arg0[%c7] : memref<11xf32, #tpu.memory_space<smem>>
    %c1_16 = arith.constant 1 : index
    %c0_17 = arith.constant 0 : index
    %c0_18 = arith.constant 0 : index
    %c0_19 = arith.constant 0 : index
    %27 = vector.load %arg2[%c1_16, %c0_17, %c0_18, %c0_19] : memref<2x4x8x128xf32, #tpu.memory_space<vmem>>, vector<1x1x8x128xf32>
    %28 = vector.shape_cast %27 : vector<1x1x8x128xf32> to vector<8x128xf32>
    %29 = vector.broadcast %26 : f32 to vector<8x128xf32>
    %30 = arith.mulf %29, %28 : vector<8x128xf32>
    %c8 = arith.constant 8 : index
    %31 = memref.load %arg0[%c8] : memref<11xf32, #tpu.memory_space<smem>>
    %c1_20 = arith.constant 1 : index
    %c1_21 = arith.constant 1 : index
    %c0_22 = arith.constant 0 : index
    %c0_23 = arith.constant 0 : index
    %32 = vector.load %arg2[%c1_20, %c1_21, %c0_22, %c0_23] : memref<2x4x8x128xf32, #tpu.memory_space<vmem>>, vector<1x1x8x128xf32>
    %33 = vector.shape_cast %32 : vector<1x1x8x128xf32> to vector<8x128xf32>
    %34 = vector.broadcast %31 : f32 to vector<8x128xf32>
    %35 = arith.mulf %34, %33 : vector<8x128xf32>
    %36 = arith.addf %30, %35 : vector<8x128xf32>
    %c9 = arith.constant 9 : index
    %37 = memref.load %arg0[%c9] : memref<11xf32, #tpu.memory_space<smem>>
    %c1_24 = arith.constant 1 : index
    %c2_25 = arith.constant 2 : index
    %c0_26 = arith.constant 0 : index
    %c0_27 = arith.constant 0 : index
    %38 = vector.load %arg2[%c1_24, %c2_25, %c0_26, %c0_27] : memref<2x4x8x128xf32, #tpu.memory_space<vmem>>, vector<1x1x8x128xf32>
    %39 = vector.shape_cast %38 : vector<1x1x8x128xf32> to vector<8x128xf32>
    %40 = vector.broadcast %37 : f32 to vector<8x128xf32>
    %41 = arith.mulf %40, %39 : vector<8x128xf32>
    %42 = arith.addf %36, %41 : vector<8x128xf32>
    %c10 = arith.constant 10 : index
    %43 = memref.load %arg0[%c10] : memref<11xf32, #tpu.memory_space<smem>>
    %c1_28 = arith.constant 1 : index
    %c3_29 = arith.constant 3 : index
    %c0_30 = arith.constant 0 : index
    %c0_31 = arith.constant 0 : index
    %44 = vector.load %arg2[%c1_28, %c3_29, %c0_30, %c0_31] : memref<2x4x8x128xf32, #tpu.memory_space<vmem>>, vector<1x1x8x128xf32>
    %45 = vector.shape_cast %44 : vector<1x1x8x128xf32> to vector<8x128xf32>
    %46 = vector.broadcast %43 : f32 to vector<8x128xf32>
    %47 = arith.mulf %46, %45 : vector<8x128xf32>
    %48 = arith.addf %42, %47 : vector<8x128xf32>
    %c1_32 = arith.constant 1 : index
    %c0_33 = arith.constant 0 : index
    %c0_34 = arith.constant 0 : index
    %49 = vector.load %arg6[%c1_32, %c0_33, %c0_34] : memref<2x8x128xf32, #tpu.memory_space<vmem>>, vector<1x8x128xf32>
    %50 = vector.shape_cast %49 : vector<1x8x128xf32> to vector<8x128xf32>
    %51 = vector.shape_cast %48 : vector<8x128xf32> to vector<1x8x128xf32>
    tpu.vector_store %arg6[%c1_32, %c0_33, %c0_34], %51 {strides = array<i32>} : memref<2x8x128xf32, #tpu.memory_space<vmem>>, vector<1x8x128xf32>,
    %c0_35 = arith.constant 0 : index
    %c0_36 = arith.constant 0 : index
    %c0_37 = arith.constant 0 : index
    %52 = vector.load %arg6[%c0_35, %c0_36, %c0_37] : memref<2x8x128xf32, #tpu.memory_space<vmem>>, vector<2x8x128xf32>
    %c0_38 = arith.constant 0 : index
    %c0_39 = arith.constant 0 : index
    %c0_40 = arith.constant 0 : index
    %53 = vector.load %arg1[%c0_38, %c0_39, %c0_40] : memref<2x16x128xf32, #tpu.memory_space<vmem>>, vector<2x16x128xf32>
    "tpu.trace_start"() <{level = 10 : i32, message = "nad,nbd->nab"}> : () -> ()
    %cst = arith.constant dense<0.000000e+00> : vector<2x16x8xf32>
    %54 = tpu.matmul %53, %52, %cst {dimension_numbers = #tpu.dot_dimension_numbers<[2], [2], [1], [1], [0, 0, 0, 1, 1, 1], [0], [0]>} : vector<2x16x128xf32>, vector<2x8x128xf32>, vector<2x16x8xf32> -> vector<2x16x8xf32>
    "tpu.trace_stop"() : () -> ()
    %cst_41 = arith.constant dense<0xFF800000> : vector<2x16xf32>
    %55 = vector.multi_reduction <maximumf>, %54, %cst_41 [2] : vector<2x16x8xf32> to vector<2x16xf32>
    %56 = vector.shape_cast %55 : vector<2x16xf32> to vector<2x16x1xf32>
    %57 = vector.broadcast %56 : vector<2x16x1xf32> to vector<2x16x8xf32>
    %58 = arith.subf %54, %57 : vector<2x16x8xf32>
    %59 = math.exp %58 : vector<2x16x8xf32>
    %cst_42 = arith.constant dense<0.000000e+00> : vector<2x16xf32>
    %60 = vector.multi_reduction <add>, %59, %cst_42 [2] : vector<2x16x8xf32> to vector<2x16xf32>
    %61 = vector.shape_cast %60 : vector<2x16xf32> to vector<2x16x1xf32>
    %62 = vector.broadcast %61 : vector<2x16x1xf32> to vector<2x16x8xf32>
    %63 = arith.divf %59, %62 : vector<2x16x8xf32>
    %cst_43 = arith.constant dense<0xFF800000> : vector<2x8xf32>
    %64 = vector.multi_reduction <maximumf>, %54, %cst_43 [1] : vector<2x16x8xf32> to vector<2x8xf32>
    %65 = vector.shape_cast %64 : vector<2x8xf32> to vector<2x1x8xf32>
    %66 = vector.broadcast %65 : vector<2x1x8xf32> to vector<2x16x8xf32>
    %67 = arith.subf %54, %66 : vector<2x16x8xf32>
    %68 = math.exp %67 : vector<2x16x8xf32>
    %cst_44 = arith.constant dense<0.000000e+00> : vector<2x8xf32>
    %69 = vector.multi_reduction <add>, %68, %cst_44 [1] : vector<2x16x8xf32> to vector<2x8xf32>
    %70 = vector.shape_cast %69 : vector<2x8xf32> to vector<2x1x8xf32>
    %71 = vector.broadcast %70 : vector<2x1x8xf32> to vector<2x16x8xf32>
    %72 = arith.divf %68, %71 : vector<2x16x8xf32>
    %cst_45 = arith.constant dense<0.000000e+00> : vector<2x8xf32>
    %73 = vector.multi_reduction <add>, %63, %cst_45 [1] : vector<2x16x8xf32> to vector<2x8xf32>
    %74 = vector.shape_cast %73 : vector<2x8xf32> to vector<2x1x8xf32>
    %cst_46 = arith.constant 1.600000e+01 : f32
    %75 = vector.broadcast %cst_46 : f32 to vector<2x1x8xf32>
    %76 = arith.divf %74, %75 : vector<2x1x8xf32>
    "tpu.trace_start"() <{level = 10 : i32, message = "nxb,nbd->nxd"}> : () -> ()
    %cst_47 = arith.constant dense<0.000000e+00> : vector<2x1x128xf32>
    %77 = tpu.matmul %76, %52, %cst_47 {dimension_numbers = #tpu.dot_dimension_numbers<[2], [1], [1], [2], [0, 0, 0, 1, 1, 2], [0], [0]>} : vector<2x1x8xf32>, vector<2x8x128xf32>, vector<2x1x128xf32> -> vector<2x1x128xf32>
    "tpu.trace_stop"() : () -> ()
    %78 = vector.shape_cast %77 : vector<2x1x128xf32> to vector<2x128xf32>
    %cst_48 = arith.constant dense<0.000000e+00> : vector<2x16xf32>
    %79 = vector.multi_reduction <add>, %72, %cst_48 [2] : vector<2x16x8xf32> to vector<2x16xf32>
    %80 = vector.shape_cast %79 : vector<2x16xf32> to vector<2x16x1xf32>
    %cst_49 = arith.constant 8.000000e+00 : f32
    %81 = vector.broadcast %cst_49 : f32 to vector<2x16x1xf32>
    %82 = arith.divf %80, %81 : vector<2x16x1xf32>
    %83 = vector.broadcast %82 : vector<2x16x1xf32> to vector<2x16x128xf32>
    %84 = arith.mulf %83, %53 : vector<2x16x128xf32>
    %cst_50 = arith.constant dense<0.000000e+00> : vector<2x128xf32>
    %85 = vector.multi_reduction <add>, %84, %cst_50 [1] : vector<2x16x128xf32> to vector<2x128xf32>
    %c0_51 = arith.constant 0 : index
    %c0_52 = arith.constant 0 : index
    %86 = vector.load %arg4[%c0_51, %c0_52] : memref<296x128xf32, #tpu.memory_space<vmem>>, vector<16x128xf32>
    %c16 = arith.constant 16 : index
    %c0_53 = arith.constant 0 : index
    %87 = vector.load %arg4[%c16, %c0_53] : memref<296x128xf32, #tpu.memory_space<vmem>>, vector<1x128xf32>
    %c24 = arith.constant 24 : index
    %c0_54 = arith.constant 0 : index
    %88 = vector.load %arg4[%c24, %c0_54] : memref<296x128xf32, #tpu.memory_space<vmem>>, vector<128x128xf32>
    %c152 = arith.constant 152 : index
    %c0_55 = arith.constant 0 : index
    %89 = vector.load %arg4[%c152, %c0_55] : memref<296x128xf32, #tpu.memory_space<vmem>>, vector<1x128xf32>
    %c160 = arith.constant 160 : index
    %c0_56 = arith.constant 0 : index
    %90 = vector.load %arg4[%c160, %c0_56] : memref<296x128xf32, #tpu.memory_space<vmem>>, vector<128x128xf32>
    %c288 = arith.constant 288 : index
    %c0_57 = arith.constant 0 : index
    %91 = vector.load %arg4[%c288, %c0_57] : memref<296x128xf32, #tpu.memory_space<vmem>>, vector<1x128xf32>
    %c0_58 = arith.constant 0 : index
    %c0_59 = arith.constant 0 : index
    %92 = vector.load %arg3[%c0_58, %c0_59] : memref<2x16xf32, #tpu.memory_space<vmem>>, vector<2x16xf32>
    %cst_60 = arith.constant dense<0.000000e+00> : vector<2x128xf32>
    %93 = tpu.matmul %92, %86, %cst_60 {dimension_numbers = #tpu.dot_dimension_numbers<[1], [0], [0], [1], [0, 0, 1, 1], [], []>} : vector<2x16xf32>, vector<16x128xf32>, vector<2x128xf32> -> vector<2x128xf32>
    %94 = vector.broadcast %87 : vector<1x128xf32> to vector<2x128xf32>
    %95 = arith.addf %93, %94 : vector<2x128xf32>
    %96 = math.tanh %95 : vector<2x128xf32>
    %c0_61 = arith.constant 0 : index
    %97 = memref.load %arg0[%c0_61] : memref<11xf32, #tpu.memory_space<smem>>
    %98 = vector.broadcast %97 : f32 to vector<2x128xf32>
    %99 = arith.mulf %98, %78 : vector<2x128xf32>
    %c1_62 = arith.constant 1 : index
    %100 = memref.load %arg0[%c1_62] : memref<11xf32, #tpu.memory_space<smem>>
    %101 = vector.broadcast %100 : f32 to vector<2x128xf32>
    %102 = arith.mulf %101, %85 : vector<2x128xf32>
    %103 = arith.addf %99, %102 : vector<2x128xf32>
    %c2_63 = arith.constant 2 : index
    %104 = memref.load %arg0[%c2_63] : memref<11xf32, #tpu.memory_space<smem>>
    %105 = vector.broadcast %104 : f32 to vector<2x128xf32>
    %106 = arith.mulf %105, %96 : vector<2x128xf32>
    %107 = arith.addf %103, %106 : vector<2x128xf32>
    %cst_64 = arith.constant dense<0.000000e+00> : vector<2x128xf32>
    %108 = tpu.matmul %107, %88, %cst_64 {dimension_numbers = #tpu.dot_dimension_numbers<[1], [0], [0], [1], [0, 0, 1, 1], [], []>} : vector<2x128xf32>, vector<128x128xf32>, vector<2x128xf32> -> vector<2x128xf32>
    %109 = vector.broadcast %89 : vector<1x128xf32> to vector<2x128xf32>
    %110 = arith.addf %108, %109 : vector<2x128xf32>
    %cst_65 = arith.constant 0.000000e+00 : f32
    %111 = vector.broadcast %cst_65 : f32 to vector<2x128xf32>
    %112 = arith.maximumf %110, %111 : vector<2x128xf32>
    %cst_66 = arith.constant dense<0.000000e+00> : vector<2x128xf32>
    %113 = tpu.matmul %112, %90, %cst_66 {dimension_numbers = #tpu.dot_dimension_numbers<[1], [0], [0], [1], [0, 0, 1, 1], [], []>} : vector<2x128xf32>, vector<128x128xf32>, vector<2x128xf32> -> vector<2x128xf32>
    %114 = vector.broadcast %91 : vector<1x128xf32> to vector<2x128xf32>
    %115 = arith.addf %113, %114 : vector<2x128xf32>
    %c0_67 = arith.constant 0 : index
    %c0_68 = arith.constant 0 : index
    %116 = vector.load %arg5[%c0_67, %c0_68] : memref<2x128xf32, #tpu.memory_space<vmem>>, vector<2x128xf32>
    tpu.vector_store %arg5[%c0_67, %c0_68], %115 {strides = array<i32>} : memref<2x128xf32, #tpu.memory_space<vmem>>, vector<2x128xf32>,
    return
  }
}

</mosaic_0001>

<bundles_post_ra>
// kernel: casfend_forward.1
= control target key start
LH: loop header
LB: loop body
LE: loop exit
PB: predicated region body
PF: predicated region fallthrough
CT: control target
= control target key end

     0   :  { %10 = vsyncpa [#allocation4], 0  ;;  %s632_s21 = smov [#allocation3]   ;;  %s949_s0 = inlined_call_operand.vmem [shape: f32[11], index: 0, kind: input, shape index: {}]   ;;  %s950_s1 = inlined_call_operand.vmem [shape: f32[2,16,128], index: 1, kind: input, shape index: {}]   ;;  %s951_s2 = inlined_call_operand.vmem [shape: f32[2,4,8,128], index: 2, kind: input, shape index: {}]   ;;  %s952_s3 = inlined_call_operand.vmem [shape: f32[2,16], index: 3, kind: input, shape index: {}]   ;;  %s953_s4 = inlined_call_operand.vmem [shape: f32[296,128], index: 4, kind: input, shape index: {}]   ;;  %s954_s5 = inlined_call_operand.vmem [shape: f32[2,128], index: 5, kind: output, shape index: {}]  }
   0x1   :  { %s16_s20 = sshll.u32 %s949_s0, 4  ;;  %s17_s20 = int_to_ptr.vmem [resolvable:$true] %s16_s20 }
   0x2   :  { %19 = dma.vmem_to_smem %s17_s20, 16, %s632_s21, [#allocation4]  }
   0x3   :  { %630 = dma.done.wait [#allocation4], 16  }
   0x4   :  { %631 = vsyncadd [#allocation4], 4294967280 }
   0x5   :  { %32 = sfence }
   0x6   :  { %s558_s22 = sld [smem:[#allocation3 + $0x3]]  ;;  %v34_v0 = vld [vmem:[%s951_s2] sm:$0xff]  ;;  %v560_v1 = vld [vmem:[%s951_s2 + $0x8] sm:$0xff]  ;;  %v562_v3 = vld [vmem:[%s951_s2 + $0x10] sm:$0xff]  ;;  %vm133_vm0 = vcmask 64512  }
   0x7   :  { %s559_s23 = sld [smem:[#allocation3 + $0x4]]  ;;  %v564_v6 = vld [vmem:[%s951_s2 + $0x18] sm:$0xff]  ;;  %v566_v9 = vld [vmem:[%s951_s2 + $0x20] sm:$0xff]  ;;  %v568_v12 = vld [vmem:[%s951_s2 + $0x28] sm:$0xff] }
   0x8   :  { %s561_s24 = sld [smem:[#allocation3 + $0x5]]  ;;  %v570_v16 = vld [vmem:[%s951_s2 + $0x30] sm:$0xff]  ;;  %v572_v19 = vld [vmem:[%s951_s2 + $0x38] sm:$0xff]  ;;  %v695_v29 = vld [vmem:[%s950_s1] sm:$0xff] }
   0x9   :  { %s563_s27 = sld [smem:[#allocation3 + $0x6]]  ;;  %v701_v31 = vld [vmem:[%s950_s1 + $0x10] sm:$0xff]  ;;  %v707_v32 = vld [vmem:[%s950_s1 + $0x8] sm:$0xff]  ;;  %v713_v33 = vld [vmem:[%s950_s1 + $0x18] sm:$0xff] }
   0xa   :  { %s565_s28 = sld [smem:[#allocation3 + $0x7]] }
   0xb   :  { %s567_s0 = sld [smem:[#allocation3 + $0x8]] }
   0xc   :  { %v35_v2 = vstv %s558_s22  ;;  %s569_s8 = sld [smem:[#allocation3 + $0x9]] }
   0xd   :  { %v36_v4 = vmul.f32 %v35_v2, %v34_v0  ;;  %v40_v5 = vstv %s559_s23  ;;  %s571_s11 = sld [smem:[#allocation3 + $0xa]] }
   0xe   :  { %v41_v7 = vmul.f32 %v560_v1, %v40_v5  ;;  %v46_v8 = vstv %s561_s24  ;;  %s901_s20 = sld [smem:[#allocation3]] }
   0xf   :  { %v47_v10 = vmul.f32 %v562_v3, %v46_v8  ;;  %v52_v11 = vstv %s563_s27  ;;  %s909_s24 = sld [smem:[#allocation3 + $0x1]] }
  0x10   :  { %v42_v13 = vadd.f32 %v41_v7, %v36_v4  ;;  %v53_v14 = vmul.f32 %v564_v6, %v52_v11  ;;  %v59_v15 = vstv %s565_s28  ;;  %s577_s25 = sld [smem:[#allocation3 + $0x2]] }
  0x11   :  { %v60_v17 = vmul.f32 %v566_v9, %v59_v15  ;;  %v64_v18 = vstv %s567_s0 }
  0x12   :  { %v48_v20 = vadd.f32 %v47_v10, %v42_v13  ;;  %v65_v21 = vmul.f32 %v568_v12, %v64_v18  ;;  %v70_v22 = vstv %s569_s8 }
  0x13   :  { %v71_v23 = vmul.f32 %v570_v16, %v70_v22  ;;  %v76_v24 = vstv %s571_s11 }
  0x14   :  { %v54_v25 = vadd.f32 %v53_v14, %v48_v20  ;;  %v66_v26 = vadd.f32 %v65_v21, %v60_v17  ;;  %v77_v27 = vmul.f32 %v572_v19, %v76_v24 }
  0x16   :  { %102 = vmatpush.xpose.msra.mxu2 %v54_v25  ;;  %v72_v28 = vadd.f32 %v71_v23, %v66_v26 }
  0x18   :  { %v78_v30 = vadd.f32 %v77_v27, %v72_v28 }
  0x19   :  { %103 = vmatmul.f32.vlgmr.msra.gmra.mxu2 %v695_v29 }
  0x1a   :  { %351 = vmatpush.msrb.mxu2 %v54_v25  ;;  %125 = vmatpush.xpose.msra.mxu1 %v78_v30 }
  0x1d   :  { %126 = vmatmul.f32.vlgmr.msra.gmra.mxu1 %v701_v31 }
  0x1e   :  { %374 = vmatpush.msrb.mxu1 %v78_v30 }
  0x21   :  { %106 = vmatmul.f32.gmra.mxu2 %v707_v32 }
  0x25   :  { %129 = vmatmul.f32.gmra.mxu1 %v713_v33 }
  0x9a   :  { %v716_v34 = vpop.f32.mrf.mxu1 }
  0x9b   :  { %v140_v35 = vsel %vm133_vm0, %v716_v34, -inf }
  0x9c   :  { %141 = vmax.xlane.f32.xlu1 %v140_v35  ;;  %v720_v36 = vpop.f32.mrf.mxu2 }
  0x9d   :  { %v134_v37 = vsel %vm133_vm0, %v720_v36, -inf }
  0x9e   :  { %135 = vmax.xlane.f32.xlu0 %v134_v37 }
  0xa2   :  { %v724_v38 = vpop.f32.mrf.mxu1 }
  0xa3   :  { %v143_v39 = vsel %vm133_vm0, %v724_v38, -inf }
  0xa4   :  { %144 = vmax.xlane.f32.xlu1 %v143_v39  ;;  %v237_v40 = vmax.f32 %v140_v35, %v143_v39  ;;  %v728_v41 = vpop.f32.mrf.mxu2 }
  0xa5   :  { %v137_v42 = vsel %vm133_vm0, %v728_v41, -inf }
  0xa6   :  { %138 = vmax.xlane.f32.xlu0 %v137_v42  ;;  %v230_v43 = vmax.f32 %v134_v37, %v137_v42  ;;  %v238_v44 = vrot.slane %v237_v40, 4 }
  0xa8   :  { %v239_v45 = vmax.f32 %v237_v40, %v238_v44  ;;  %v231_v47 = vrot.slane %v230_v43, 4 }
  0xaa   :  { %v240_v46 = vrot.slane %v239_v45, 2  ;;  %v232_v49 = vmax.f32 %v230_v43, %v231_v47 }
  0xac   :  { %v241_v48 = vmax.f32 %v239_v45, %v240_v46  ;;  %v233_v51 = vrot.slane %v232_v49, 2 }
  0xae   :  { %v242_v50 = vrot.slane %v241_v48, 1  ;;  %v234_v53 = vmax.f32 %v232_v49, %v233_v51 }
  0xb0   :  { %v243_v52 = vmax.f32 %v241_v48, %v242_v50  ;;  %v235_v55 = vrot.slane %v234_v53, 1 }
  0xb2   :  { %v246_v54 = vsub.f32 %v716_v34, %v243_v52  ;;  %v247_v56 = vsub.f32 %v724_v38, %v243_v52  ;;  %v236_v58 = vmax.f32 %v234_v53, %v235_v55 }
  0xb4   :  { %v252_v57 = vmul.f32 1.442695, %v246_v54  ;;  %v254_v59 = vmul.f32 1.442695, %v247_v56  ;;  %v245_v60 = vsub.f32 %v728_v41, %v236_v58  ;;  %v244_v61 = vsub.f32 %v720_v36, %v236_v58 }
  0xb6   :  { %584 = vpow2.f32 %v252_v57  ;;  %v250_v62 = vmul.f32 1.442695, %v245_v60  ;;  %v248_v63 = vmul.f32 1.442695, %v244_v61 }
  0xb7   :  { %586 = vpow2.f32 %v254_v59 }
  0xb8   :  { %588 = vpow2.f32 %v250_v62 }
  0xb9   :  { %590 = vpow2.f32 %v248_v63 }
  0xbc   :  { %v736_v0 = vpop.eup %584 }
  0xbd   :  { %v738_v1 = vpop.eup %586  ;;  %v265_v2 = vsel %vm133_vm0, %v736_v0, 0.0 }
  0xbe   :  { %v266_v3 = vsel %vm133_vm0, %v738_v1, 0.0  ;;  %v744_v5 = vpop.eup %588 }
  0xbf   :  { %v267_v4 = vadd.f32 %v266_v3, %v265_v2  ;;  %v746_v6 = vpop.eup %590  ;;  %v257_v8 = vsel %vm133_vm0, %v744_v5, 0.0 }
  0xc0   :  { %v256_v9 = vsel %vm133_vm0, %v746_v6, 0.0 }
  0xc1   :  { %v268_v7 = vrot.slane %v267_v4, 4  ;;  %v258_v11 = vadd.f32 %v257_v8, %v256_v9 }
  0xc3   :  { %v269_v10 = vadd.f32 %v268_v7, %v267_v4  ;;  %v259_v13 = vrot.slane %v258_v11, 4 }
  0xc5   :  { %v270_v12 = vrot.slane %v269_v10, 2  ;;  %v260_v15 = vadd.f32 %v259_v13, %v258_v11 }
  0xc7   :  { %v271_v14 = vadd.f32 %v270_v12, %v269_v10  ;;  %v261_v17 = vrot.slane %v260_v15, 2 }
  0xc9   :  { %v272_v16 = vrot.slane %v271_v14, 1  ;;  %v262_v19 = vadd.f32 %v261_v17, %v260_v15 }
  0xcb   :  { %v273_v18 = vadd.f32 %v272_v16, %v271_v14  ;;  %v263_v20 = vrot.slane %v262_v19, 1 }
  0xcd   :  { %592 = vrcp.f32 %v273_v18  ;;  %v264_v21 = vadd.f32 %v263_v20, %v262_v19  ;;  %v301_v44 = vand.u32 2147483648, %v273_v18  ;;  %vm295_vm2 = vweird.f32 %v273_v18 }
  0xce   :  { %v299_v46 = vand.u32 2147483647, %v273_v18 }
  0xcf   :  { %594 = vrcp.f32 %v264_v21  ;;  %v302_v52 = vor.u32 1.1754944e-38, %v301_v44  ;;  %v285_v58 = vand.u32 2147483648, %v264_v21  ;;  %vm279_vm6 = vweird.f32 %v264_v21 }
  0xd0   :  { %vm300_vm4 = vcmp.eq.f32.partialorder %v299_v46, 8.507059e+37  ;;  %v283_v59 = vand.u32 2147483647, %v264_v21 }
  0xd1   :  { %v286_v62 = vor.u32 1.1754944e-38, %v285_v58 }
  0xd2   :  { %vm284_vm8 = vcmp.eq.f32.partialorder %v283_v59, 8.507059e+37 }
  0xd3   :  { %v593_v22 = vpop.eup %592 }
  0xd4   :  { %v291_v23 = vmul.f32 %v593_v22, %v273_v18  ;;  %vm296_vm1 = vweird.f32 %v593_v22 }
  0xd5   :  { %v595_v25 = vpop.eup %594  ;;  %vm297_vm3 = vmor %vm295_vm2, %vm296_vm1 }
  0xd6   :  { %v292_v24 = vsub.f32 1.0, %v291_v23  ;;  %v275_v35 = vmul.f32 %v595_v25, %v264_v21  ;;  %vm280_vm5 = vweird.f32 %v595_v25 }
  0xd7   :  { %vm281_vm7 = vmor %vm279_vm6, %vm280_vm5 }
  0xd8   :  { %v293_v30 = vmul.f32 %v593_v22, %v292_v24  ;;  %v276_v43 = vsub.f32 1.0, %v275_v35  ;;  %v633_v24 = vmov 16.0  }
  0xda   :  { %v294_v42 = vadd.f32 %v593_v22, %v293_v30  ;;  %v277_v49 = vmul.f32 %v595_v25, %v276_v43  ;;  %v420_v30 = vld [vmem:[%s953_s4] sm:$0xff] }
  0xdc   :  { %v298_v48 = vsel %vm297_vm3, %v593_v22, %v294_v42  ;;  %v278_v57 = vadd.f32 %v595_v25, %v277_v49  ;;  %v438_v42 = vld [vmem:[%s953_s4 + $0x90] sm:$0xff] }
  0xdd   :  { %510 = vmatpush.msra.mxu3 %v438_v42  ;;  %v495_v42 = vstv %s577_s25 }
  0xde   :  { %v282_v60 = vsel %vm281_vm7, %v595_v25, %v278_v57 }
  0xdf   :  { %v287_v4 = vsel %vm284_vm8, %v286_v62, %v282_v60 }
  0xe0   :  { %v288_v7 = vmul.f32 %v746_v6, %v287_v4  ;;  %v289_v11 = vmul.f32 %v744_v5, %v287_v4 }
  0xe2   :  { %v379_v9 = vsel %vm133_vm0, %v288_v7, 0.0  ;;  %v382_v12 = vsel %vm133_vm0, %v289_v11, 0.0 }
 0x10f   :  { %v142_v26 = vpop.xlane.xlu1 %141 }
 0x110   :  { %v148_v27 = vsub.f32 %v716_v34, %v142_v26 }
 0x111   :  { %v136_v28 = vpop.xlane.xlu0 %135 }
 0x112   :  { %v154_v37 = vmul.f32 1.442695, %v148_v27  ;;  %v146_v39 = vsub.f32 %v720_v36, %v136_v28  ;;  %v421_v28 = vld [vmem:[%s953_s4 + $0x8] sm:$0xff] }
 0x113   :  { %477 = vmatpush.msra.mxu2 %v421_v28 }
 0x114   :  { %596 = vpow2.f32 %v154_v37  ;;  %v150_v40 = vmul.f32 1.442695, %v146_v39 }
 0x115   :  { %478 = vmatpush.msra.mxu2 %v420_v30 }
 0x116   :  { %598 = vpow2.f32 %v150_v40 }
 0x117   :  { %v145_v45 = vpop.xlane.xlu1 %144 }
 0x118   :  { %v149_v47 = vsub.f32 %v724_v38, %v145_v45  ;;  %v303_v38 = vsel %vm300_vm4, %v302_v52, %v298_v48 }
 0x119   :  { %v139_v34 = vpop.xlane.xlu0 %138  ;;  %v304_v8 = vmul.f32 %v736_v0, %v303_v38 }
 0x11a   :  { %v755_v50 = vpop.eup %596  ;;  %v156_v51 = vmul.f32 1.442695, %v149_v47  ;;  %v147_v36 = vsub.f32 %v728_v41, %v139_v34  ;;  %v305_v41 = vmul.f32 %v738_v1, %v303_v38  ;;  %v435_v34 = vld [vmem:[%s953_s4 + $0x78] sm:$0xff] }
 0x11b   :  { %v164_v53 = vsel %vm133_vm0, %v755_v50, 0.0  ;;  %v385_v10 = vsel %vm133_vm0, %v304_v8, 0.0 }
 0x11c   :  { %v760_v54 = vpop.eup %598  ;;  %600 = vpow2.f32 %v156_v51  ;;  %165 = vadd.xlane.f32.xlu0 %v164_v53  ;;  %v152_v55 = vmul.f32 1.442695, %v147_v36  ;;  %v388_v2 = vsel %vm133_vm0, %v305_v41, 0.0 }
 0x11d   :  { %v158_v56 = vsel %vm133_vm0, %v760_v54, 0.0 }
 0x11e   :  { %602 = vpow2.f32 %v152_v55  ;;  %159 = vadd.xlane.f32.xlu2 %v158_v56 }
 0x122   :  { %v765_v61 = vpop.eup %600 }
 0x123   :  { %v167_v63 = vsel %vm133_vm0, %v765_v61, 0.0 }
 0x124   :  { %v770_v3 = vpop.eup %602  ;;  %168 = vadd.xlane.f32.xlu1 %v167_v63  ;;  %389 = vadd.xlane.f32.xlu0 %v388_v2 }
 0x125   :  { %v161_v1 = vsel %vm133_vm0, %v770_v3, 0.0 }
 0x126   :  { %162 = vadd.xlane.f32.xlu2 %v161_v1 }
 0x12c   :  { %380 = vadd.xlane.f32.xlu1 %v379_v9 }
 0x12e   :  { %386 = vadd.xlane.f32.xlu2 %v385_v10 }
 0x136   :  { %383 = vadd.xlane.f32.xlu2 %v382_v12 }
 0x18f   :  { %v166_v13 = vpop.xlane.xlu0 %165 }
 0x190   :  { %604 = vrcp.f32 %v166_v13  ;;  %v209_v21 = vand.u32 2147483647, %v166_v13  ;;  %v211_v26 = vand.u32 2147483648, %v166_v13  ;;  %vm205_vm10 = vweird.f32 %v166_v13 }
 0x191   :  { %v160_v14 = vpop.xlane.xlu2 %159 }
 0x192   :  { %606 = vrcp.f32 %v160_v14  ;;  %v179_v27 = vand.u32 2147483647, %v160_v14  ;;  %vm794_vm13 = vcmp.eq.f32.partialorder %v209_v21, 8.507059e+37  ;;  %v181_v43 = vand.u32 2147483648, %v160_v14 }
 0x193   :  { %vm175_vm14 = vweird.f32 %v160_v14  ;;  %v212_v47 = vor.u32 1.1754944e-38, %v211_v26 }
 0x194   :  { %vm805_vm1 = vcmp.eq.f32.partialorder %v179_v27, 8.507059e+37  ;;  %v182_v56 = vor.u32 1.1754944e-38, %v181_v43  ;;  %v437_v43 = vld [vmem:[%s953_s4 + $0x88] sm:$0xff] }
 0x195   :  { %511 = vmatpush.msra.mxu3 %v437_v43  ;;  %v444_v43 = vld [vmem:[%s953_s4 + $0xc0] sm:$0xff] }
 0x196   :  { %v605_v15 = vpop.eup %604 }
 0x197   :  { %v201_v16 = vmul.f32 %v605_v15, %v166_v13  ;;  %v169_v6 = vpop.xlane.xlu1 %168  ;;  %vm206_vm9 = vweird.f32 %v605_v15 }
 0x198   :  { %v607_v17 = vpop.eup %606  ;;  %608 = vrcp.f32 %v169_v6  ;;  %vm790_vm12 = vmor %vm205_vm10, %vm206_vm9  ;;  %v224_v49 = vand.u32 2147483647, %v169_v6  ;;  %v226_v51 = vand.u32 2147483648, %v169_v6  ;;  %vm220_vm3 = vweird.f32 %v169_v6 }
 0x199   :  { %v202_v0 = vsub.f32 1.0, %v201_v16  ;;  %v171_v18 = vmul.f32 %v607_v17, %v160_v14  ;;  %v780_v19 = vpop.xlane.xlu2 %162  ;;  %vm176_vm11 = vweird.f32 %v607_v17 }
 0x19a   :  { %610 = vrcp.f32 %v780_v19  ;;  %vm801_vm15 = vmor %vm175_vm14, %vm176_vm11  ;;  %v196_v57 = vand.u32 2147483648, %v780_v19  ;;  %v194_v59 = vand.u32 2147483647, %v780_v19  ;;  %vm225_vm6 = vcmp.eq.f32.partialorder %v224_v49, 8.507059e+37  ;;  %v434_v49 = vld [vmem:[%s953_s4 + $0x70] sm:$0xff] }
 0x19b   :  { %v203_v20 = vmul.f32 %v605_v15, %v202_v0  ;;  %v172_v5 = vsub.f32 1.0, %v171_v18  ;;  %612 = vrcp.f32 %v633_v24  ;;  %v227_v62 = vor.u32 1.1754944e-38, %v226_v51  ;;  %v433_v51 = vld [vmem:[%s953_s4 + $0x68] sm:$0xff] }
 0x19c   :  { %vm190_vm7 = vweird.f32 %v780_v19  ;;  %v197_v8 = vor.u32 1.1754944e-38, %v196_v57  ;;  %vm195_vm9 = vcmp.eq.f32.partialorder %v194_v59, 8.507059e+37  ;;  %vm459_vm11 = vcmask 130048   ;;  %v430_v57 = vld [vmem:[%s953_s4 + $0x50] sm:$0xff]  ;;  %v429_v59 = vld [vmem:[%s953_s4 + $0x48] sm:$0xff] }
 0x19d   :  { %v204_v22 = vadd.f32 %v605_v15, %v203_v20  ;;  %v173_v23 = vmul.f32 %v607_v17, %v172_v5 }
 0x19e   :  { %v609_v25 = vpop.eup %608 }
 0x19f   :  { %v174_v35 = vadd.f32 %v607_v17, %v173_v23  ;;  %v216_v37 = vmul.f32 %v609_v25, %v169_v6  ;;  %v208_v44 = vsel %vm790_vm12, %v605_v15, %v204_v22  ;;  %vm221_vm2 = vweird.f32 %v609_v25 }
 0x1a0   :  { %v611_v39 = vpop.eup %610  ;;  %v213_v38 = vsel %vm794_vm13, %v212_v47, %v208_v44  ;;  %vm222_vm5 = vmor %vm220_vm3, %vm221_vm2  ;;  %v436_v47 = vld [vmem:[%s953_s4 + $0x80] sm:$0xff]  ;;  %vm507_vm12 = vcmask 1041409  }
 0x1a1   :  { %v217_v45 = vsub.f32 1.0, %v216_v37  ;;  %v186_v46 = vmul.f32 %v611_v39, %v780_v19  ;;  %v613_v36 = vpop.eup %612  ;;  %v178_v52 = vsel %vm801_vm15, %v607_v17, %v174_v35  ;;  %vm191_vm4 = vweird.f32 %v611_v39  ;;  %v457_v37 = vld [vmem:[%s952_s3] sm:$0x3]  ;;  %512 = vmatpush.msra.mxu3 %v436_v47  ;;  %v443_v47 = vld [vmem:[%s953_s4 + $0xb8] sm:$0xff] }
 0x1a2   :  { %v183_v60 = vsel %vm805_vm1, %v182_v56, %v178_v52  ;;  %v325_v63 = vmul.f32 16.0, %v613_v36  ;;  %v214_v2 = vmul.f32 %v755_v50, %v213_v38  ;;  %vm192_vm8 = vmor %vm190_vm7, %vm191_vm4  ;;  %vm329_vm10 = vweird.f32 %v613_v36  ;;  %v432_v52 = vld [vmem:[%s953_s4 + $0x60] sm:$0xff]  ;;  %v390_v38 = vpop.xlane.xlu0 %389 }
 0x1a3   :  { %v218_v53 = vmul.f32 %v609_v25, %v217_v45  ;;  %v187_v55 = vsub.f32 1.0, %v186_v46  ;;  %v184_v9 = vmul.f32 %v760_v54, %v183_v60  ;;  %v387_v46 = vpop.xlane.xlu2 %386  ;;  %513 = vmatpush.msra.mxu3 %v435_v34 }
 0x1a4   :  { %v315_v13 = vsel %vm133_vm0, %v214_v2, 0.0  ;;  %v326_v15 = vsub.f32 1.0, %v325_v63  ;;  %v428_v63 = vld [vmem:[%s953_s4 + $0x40] sm:$0xff] }
 0x1a5   :  { %v219_v58 = vadd.f32 %v609_v25, %v218_v53  ;;  %v188_v41 = vmul.f32 %v611_v39, %v187_v55  ;;  %v306_v6 = vsel %vm133_vm0, %v184_v9, 0.0  ;;  %514 = vmatpush.msra.mxu3 %v434_v49  ;;  %v431_v53 = vld [vmem:[%s953_s4 + $0x58] sm:$0xff]  ;;  %v426_v9 = vld [vmem:[%s953_s4 + $0x30] sm:$0xff] }
 0x1a6   :  { %v327_v54 = vmul.f32 %v613_v36, %v326_v15  ;;  %v453_v15 = vld [vmem:[%s953_s4 + $0x108] sm:$0xff] }
 0x1a7   :  { %v223_v4 = vsel %vm222_vm5, %v609_v25, %v219_v58  ;;  %v189_v1 = vadd.f32 %v611_v39, %v188_v41  ;;  %515 = vmatpush.msra.mxu3 %v433_v51  ;;  %v381_v41 = vpop.xlane.xlu1 %380 }
 0x1a8   :  { %v228_v7 = vsel %vm225_vm6, %v227_v62, %v223_v4  ;;  %v328_v21 = vadd.f32 %v613_v36, %v327_v54 }
 0x1a9   :  { %v229_v10 = vmul.f32 %v765_v61, %v228_v7  ;;  %v193_v11 = vsel %vm192_vm8, %v611_v39, %v189_v1  ;;  %v634_v39 = vmov 8.0   ;;  %516 = vmatpush.msra.mxu3 %v432_v52  ;;  %v427_v1 = vld [vmem:[%s953_s4 + $0x38] sm:$0xff] }
 0x1aa   :  { %v198_v12 = vsel %vm195_vm9, %v197_v8, %v193_v11  ;;  %614 = vrcp.f32 %v634_v39 }
 0x1ab   :  { %v316_v14 = vsel %vm133_vm0, %v229_v10, 0.0  ;;  %v199_v50 = vmul.f32 %v770_v3, %v198_v12  ;;  %v330_v3 = vsel %vm329_vm10, %v613_v36, %v328_v21  ;;  %v384_v56 = vpop.xlane.xlu2 %383  ;;  %517 = vmatpush.msra.mxu3 %v431_v53 }
 0x1ac   :  { %v317_v16 = vadd.f32 %v316_v14, %v315_v13  ;;  %v423_v13 = vld [vmem:[%s953_s4 + $0x18] sm:$0xff]  ;;  %v454_v14 = vld [vmem:[%s953_s4 + $0x110] sm:$0xff] }
 0x1ad   :  { %v307_v17 = vsel %vm133_vm0, %v199_v50, 0.0  ;;  %518 = vmatpush.msra.mxu3 %v430_v57 }
 0x1ae   :  { %v308_v0 = vadd.f32 %v307_v17, %v306_v6  ;;  %v318_v18 = vrot.slane %v317_v16, 4  ;;  %v452_v6 = vld [vmem:[%s953_s4 + $0x100] sm:$0xff] }
 0x1af   :  { %519 = vmatpush.msra.mxu3 %v429_v59  ;;  %v440_v59 = vld [vmem:[%s953_s4 + $0xa0] sm:$0xff] }
 0x1b0   :  { %v319_v19 = vadd.f32 %v318_v18, %v317_v16  ;;  %v309_v61 = vrot.slane %v308_v0, 4  ;;  %v615_v40 = vpop.eup %614  ;;  %v451_v18 = vld [vmem:[%s953_s4 + $0xf8] sm:$0xff] }
 0x1b1   :  { %v392_v44 = vmul.f32 8.0, %v615_v40  ;;  %520 = vmatpush.msra.mxu3 %v428_v63 }
 0x1b2   :  { %v320_v20 = vrot.slane %v319_v19, 2  ;;  %v310_v5 = vadd.f32 %v309_v61, %v308_v0 }
 0x1b3   :  { %v393_v45 = vsub.f32 1.0, %v392_v44  ;;  %521 = vmatpush.msra.mxu3 %v427_v1 }
 0x1b4   :  { %v321_v22 = vadd.f32 %v320_v20, %v319_v19  ;;  %v311_v23 = vrot.slane %v310_v5, 2  ;;  %v450_v19 = vld [vmem:[%s953_s4 + $0xf0] sm:$0xff] }
 0x1b5   :  { %v394_v48 = vmul.f32 %v615_v40, %v393_v45  ;;  %522 = vmatpush.msra.mxu3 %v426_v9  ;;  %v581_v20 = vld [vmem:[%s953_s4 + $0x10] ss:$0 sm:$0xff] }
 0x1b6   :  { %v322_v24 = vrot.slane %v321_v22, 1  ;;  %v312_v25 = vadd.f32 %v311_v23, %v310_v5  ;;  %v449_v5 = vld [vmem:[%s953_s4 + $0xe8] sm:$0xff] }
 0x1b7   :  { %v395_v36 = vadd.f32 %v615_v40, %v394_v48 }
 0x1b8   :  { %v323_v26 = vadd.f32 %v322_v24, %v321_v22  ;;  %v313_v27 = vrot.slane %v312_v25, 1  ;;  %v448_v22 = vld [vmem:[%s953_s4 + $0xe0] sm:$0xff] }
 0x1ba   :  { %v332_v28 = vmul.f32 %v330_v3, %v323_v26  ;;  %v314_v30 = vadd.f32 %v313_v27, %v312_v25  ;;  %v446_v27 = vld [vmem:[%s953_s4 + $0xd0] sm:$0xff] }
 0x1bc   :  { %574 = vmatmul.msk.f32.vlgmr.msrb.gmra.mxu1 %vm133_vm0, %v332_v28  ;;  %v331_v35 = vmul.f32 %v330_v3, %v314_v30  ;;  %v447_v3 = vld [vmem:[%s953_s4 + $0xd8] sm:$0xff] }
 0x1be   :  { %573 = vmatmul.msk.f32.vlgmr.msrb.gmra.mxu2 %vm133_vm0, %v331_v35  ;;  %vm396_vm0 = vweird.f32 %v615_v40  ;;  %v485_v35 = vstv %s901_s20 }
 0x1bf   :  { %v397_v55 = vsel %vm396_vm0, %v615_v40, %v395_v36  ;;  %v489_v40 = vstv %s909_s24 }
 0x1c0   :  { %v400_v58 = vmul.f32 %v397_v55, %v387_v46  ;;  %v401_v60 = vmul.f32 %v397_v55, %v390_v38  ;;  %v399_v62 = vmul.f32 %v397_v55, %v384_v56  ;;  %v398_v2 = vmul.f32 %v397_v55, %v381_v41  ;;  %v441_v41 = vld [vmem:[%s953_s4 + $0xa8] sm:$0xff] }
 0x1c2   :  { %v404_v4 = vmul.f32 %v400_v58, %v701_v31  ;;  %v405_v7 = vmul.f32 %v401_v60, %v713_v33  ;;  %v403_v8 = vmul.f32 %v399_v62, %v707_v32  ;;  %v402_v10 = vmul.f32 %v398_v2, %v695_v29  ;;  %v425_v31 = vld [vmem:[%s953_s4 + $0x28] sm:$0xff]  ;;  %v424_v33 = vld [vmem:[%s953_s4 + $0x20] sm:$0xff]  ;;  %v455_v29 = vld [vmem:[%s953_s4 + $0x118] sm:$0xff] }
 0x1c3   :  { %523 = vmatpush.msra.mxu3 %v425_v31  ;;  %532 = vmatpush.msra.mxu0 %v455_v29  ;;  %v442_v58 = vld [vmem:[%s953_s4 + $0xb0] sm:$0xff]  ;;  %v582_v60 = vld [vmem:[%s953_s4 + $0x98] ss:$0 sm:$0xff] }
 0x1c4   :  { %v413_v11 = vadd.f32 %v405_v7, %v404_v4  ;;  %v406_v12 = vadd.f32 %v403_v8, %v402_v10  ;;  %v583_v4 = vld [vmem:[%s953_s4 + $0x120] ss:$0 sm:$0xff] }
 0x1c5   :  { %524 = vmatpush.msra.mxu3 %v424_v33  ;;  %533 = vmatpush.msra.mxu0 %v454_v14 }
 0x1c6   :  { %575 = vmatmul.msk.f32.vlgmr.msra.gmra.mxu2 %vm459_vm11, %v457_v37  ;;  %v414_v32 = vrot.slane %v413_v11, 4  ;;  %v407_v50 = vrot.slane %v406_v12, 4  ;;  %v445_v37 = vld [vmem:[%s953_s4 + $0xc8] sm:$0xff] }
 0x1c7   :  { %525 = vmatpush.msra.mxu3 %v423_v13  ;;  %534 = vmatpush.msra.mxu0 %v453_v15 }
 0x1c8   :  { %v415_v16 = vadd.f32 %v414_v32, %v413_v11  ;;  %v408_v17 = vadd.f32 %v407_v50, %v406_v12 }
 0x1c9   :  { %535 = vmatpush.msra.mxu0 %v452_v6 }
 0x1ca   :  { %v416_v54 = vrot.slane %v415_v16, 2  ;;  %v409_v61 = vrot.slane %v408_v17, 2 }
 0x1cb   :  { %536 = vmatpush.msra.mxu0 %v451_v18 }
 0x1cc   :  { %v417_v21 = vadd.f32 %v416_v54, %v415_v16  ;;  %v410_v23 = vadd.f32 %v409_v61, %v408_v17 }
 0x1cd   :  { %537 = vmatpush.msra.mxu0 %v450_v19 }
 0x1ce   :  { %v418_v26 = vrot.slane %v417_v21, 1  ;;  %v411_v28 = vrot.slane %v410_v23, 1 }
 0x1cf   :  { %538 = vmatpush.msra.mxu0 %v449_v5 }
 0x1d0   :  { %v419_v39 = vadd.f32 %v418_v26, %v417_v21  ;;  %v412_v45 = vadd.f32 %v411_v28, %v410_v23 }
 0x1d1   :  { %539 = vmatpush.msra.mxu0 %v448_v22 }
 0x1d2   :  { %v491_v34 = vmul.f32 %v489_v40, %v419_v39  ;;  %v490_v36 = vmul.f32 %v489_v40, %v412_v45 }
 0x1d3   :  { %540 = vmatpush.msra.mxu0 %v447_v3 }
 0x1d5   :  { %541 = vmatpush.msra.mxu0 %v446_v27 }
 0x1d7   :  { %542 = vmatpush.msra.mxu0 %v445_v37 }
 0x1d9   :  { %543 = vmatpush.msra.mxu0 %v444_v43 }
 0x1db   :  { %544 = vmatpush.msra.mxu0 %v443_v47 }
 0x1dd   :  { %545 = vmatpush.msra.mxu0 %v442_v58 }
 0x1df   :  { %546 = vmatpush.msra.mxu0 %v441_v41 }
 0x1e1   :  { %547 = vmatpush.msra.mxu0 %v440_v59 }
 0x239   :  { %v376_v30 = vpop.f32.mrf.mxu1 }
 0x23a   :  { %v487_v44 = vmul.f32 %v485_v35, %v376_v30 }
 0x23c   :  { %v493_v51 = vadd.f32 %v491_v34, %v487_v44 }
 0x241   :  { %v353_v0 = vpop.f32.mrf.mxu2 }
 0x242   :  { %v486_v48 = vmul.f32 %v485_v35, %v353_v0 }
 0x244   :  { %v492_v53 = vadd.f32 %v490_v36, %v486_v48 }
 0x249   :  { %v480_v24 = vpop.f32.mrf.mxu2 }
 0x24a   :  { %v481_v25 = vadd.f32 %v581_v20, %v480_v24 }
 0x24c   :  { %616 = vtanh.f32 %v481_v25 }
 0x252   :  { %v617_v46 = vpop.eup %616 }
 0x253   :  { %v496_v49 = vmul.f32 %v617_v46, %v495_v42 }
 0x255   :  { %v498_v52 = vrot.slane %v496_v49, 1  ;;  %v501_v38 = vadd.f32 %v496_v49, %v492_v53 }
 0x257   :  { %v502_v55 = vadd.f32 %v498_v52, %v493_v51 }
 0x259   :  { %v506_v56 = vrot.slane %v502_v55, 7 }
 0x25b   :  { %v508_v57 = vsel %vm507_vm12, %v506_v56, %v501_v38 }
 0x25c   :  { %526 = vmatmul.f32.vlgmr.msra.gmra.mxu3 %v508_v57 }
 0x2df   :  { %v527_v62 = vpop.f32.mrf.mxu3 }
 0x2e0   :  { %v528_v63 = vadd.f32 %v582_v60, %v527_v62 }
 0x2e2   :  { %v530_v2 = vmax.f32 %v528_v63, 0.0 }
 0x2e4   :  { %548 = vmatmul.f32.vlgmr.msra.gmra.mxu0 %v530_v2 }
 0x361   :  { %v549_v1 = vpop.f32.mrf.mxu0 }
 0x362   :  { %v550_v7 = vadd.f32 %v583_v4, %v549_v1 }
 0x364   :  { %552 = vst [vmem:[%s954_s5] sm:$0x3] %v550_v7 }
 0x365   :  { %557 = vsyncpa [#allocation4], 1 }

</bundles_post_ra>
